<compile_context>
chip_gen: v7x
topology: tpu7x:2x2x1
jax: 0.10.0
libtpu: 0.0.40
codegen_flags: <defaults>
</compile_context>

<pallas_src>
import functools

import jax
import jax.numpy as jnp
from jax.experimental import pallas as pl
from jax.experimental.pallas import tpu as pltpu

HIDDEN = 768
FC1_OUT = 256
NUM_CLASSES = 2
OUT_PAD = 8            # padded class dim (full-array last dim -> legal block)
MAX_TB = 1024          # batch-tile cap; VMEM use stays tiny even at 1024


def _round_up(n, m):
    return ((n + m - 1) // m) * m


def _choose_tb(B):
    """Batch tile: sublane-aligned, >=2 grid steps when B > 16 (v7x megacore)."""
    if B <= 16:
        return 16
    return min(MAX_TB, _round_up(-(-B // 2), 16))


def _mlp_kernel(x_ref, w1_ref, b1_ref, w2_ref, b2_ref, o_ref):
    # fc1: [TB, 768] @ [768, 256] on the MXU with f32 accumulation.
    x = x_ref[...].astype(jnp.bfloat16)            # no-op if x is already bf16
    h = jnp.dot(x, w1_ref[...], preferred_element_type=jnp.float32)
    # bias + ReLU on the f32 accumulator (no bf16 VALU needed -> v5e-safe).
    h = jnp.maximum(h + b1_ref[...], 0.0)
    # fc2: [TB, 256]bf16 @ [256, OUT_PAD]bf16 -> f32; store masks the tail rows.
    out = jnp.dot(h.astype(jnp.bfloat16), w2_ref[...],
                  preferred_element_type=jnp.float32)
    o_ref[...] = (out + b2_ref[...]).astype(o_ref.dtype)


def prepare_params(w1, b1, w2, b2):
    """One-time weight prep (call at init, NOT per forward).

    w1: [HIDDEN, 256], b1: [256] or [1,256], w2: [256, C], b2: [C] or [1,C].
    Returns bf16 weights with the class dim zero-padded to OUT_PAD and f32
    biases, in the layout the kernel expects.
    """
    num_classes = w2.shape[-1]
    assert num_classes <= OUT_PAD, (num_classes, OUT_PAD)
    w1_b = jnp.asarray(w1, jnp.bfloat16)
    b1_f = jnp.asarray(b1, jnp.float32).reshape(1, FC1_OUT)
    w2_p = jnp.zeros((FC1_OUT, OUT_PAD), jnp.bfloat16).at[:, :num_classes].set(
        jnp.asarray(w2, jnp.bfloat16))
    b2_p = jnp.zeros((1, OUT_PAD), jnp.float32).at[:, :num_classes].set(
        jnp.asarray(b2, jnp.float32).reshape(1, num_classes))
    return w1_b, b1_f, w2_p, b2_p


@functools.partial(jax.jit, static_argnames=("num_classes",))
def audio_classifier_forward(x, w1_b, b1_f, w2_p, b2_p,
                             num_classes=NUM_CLASSES):
    """x: [B, HIDDEN] (bf16 preferred, f32 accepted). Returns [B, num_classes] f32."""
    B, hidden = x.shape
    assert hidden == HIDDEN

    TB = _choose_tb(B)
    grid = (pl.cdiv(B, TB),)

    cost = pl.CostEstimate(
        flops=2 * B * HIDDEN * FC1_OUT + 2 * B * FC1_OUT * OUT_PAD,
        transcendentals=0,
        bytes_accessed=int(x.size * jnp.dtype(x.dtype).itemsize
                           + w1_b.size * 2 + w2_p.size * 2
                           + b1_f.size * 4 + b2_p.size * 4
                           + B * OUT_PAD * 4),
    )

    out_pad = pl.pallas_call(
        _mlp_kernel,
        out_shape=jax.ShapeDtypeStruct((B, OUT_PAD), jnp.float32),
        grid=grid,
        in_specs=[
            pl.BlockSpec((TB, HIDDEN), lambda i: (i, 0)),        # x: batch-tiled
            pl.BlockSpec((HIDDEN, FC1_OUT), lambda i: (0, 0)),   # w1: VMEM-resident
            pl.BlockSpec((1, FC1_OUT), lambda i: (0, 0)),        # b1: VMEM-resident
            pl.BlockSpec((FC1_OUT, OUT_PAD), lambda i: (0, 0)),  # w2: VMEM-resident
            pl.BlockSpec((1, OUT_PAD), lambda i: (0, 0)),        # b2: VMEM-resident
        ],
        out_specs=pl.BlockSpec((TB, OUT_PAD), lambda i: (i, 0)),
        compiler_params=pltpu.CompilerParams(
            dimension_semantics=("parallel",)),
        cost_estimate=cost,
    )(x, w1_b, b1_f, w2_p, b2_p)

    # Only the padded class lanes are dropped; no batch padding ever existed.
    return out_pad[:, :num_classes]


def init_params(key, hidden_size=HIDDEN, num_classes=NUM_CLASSES):
    """Deterministic init mimicking nn.Linear's uniform(-1/sqrt(fan_in), ...),
    already run through prepare_params (weights stored as (in, out))."""
    k1, k2, k3, k4 = jax.random.split(key, 4)
    bound1 = 1.0 / jnp.sqrt(hidden_size)
    bound2 = 1.0 / jnp.sqrt(FC1_OUT)
    w1 = jax.random.uniform(k1, (hidden_size, FC1_OUT), jnp.float32,
                            -bound1, bound1)
    b1 = jax.random.uniform(k2, (FC1_OUT,), jnp.float32, -bound1, bound1)
    w2 = jax.random.uniform(k3, (FC1_OUT, num_classes), jnp.float32,
                            -bound2, bound2)
    b2 = jax.random.uniform(k4, (num_classes,), jnp.float32, -bound2, bound2)
    return prepare_params(w1, b1, w2, b2)


if __name__ == "__main__":
    key = jax.random.PRNGKey(0)
    k_in, k_params = jax.random.split(key)

    B = 4
    # bf16 activations: the kernel reads them directly, no wrapper pad/cast pass.
    features = jax.random.normal(k_in, (B, HIDDEN), jnp.float32).astype(
        jnp.bfloat16)
    w1_b, b1_f, w2_p, b2_p = init_params(k_params)

    logits = audio_classifier_forward(features, w1_b, b1_f, w2_p, b2_p)
    logits = jax.block_until_ready(logits)

    # Reference in plain JAX, mirroring the kernel's bf16 operand / f32 accum.
    xf = features.astype(jnp.float32)
    w1f = w1_b.astype(jnp.float32)
    w2f = w2_p[:, :NUM_CLASSES].astype(jnp.float32)
    b2f = b2_p[:, :NUM_CLASSES]
    h = jnp.maximum(xf @ w1f + b1_f, 0.0)
    ref = h.astype(jnp.bfloat16).astype(jnp.float32) @ w2f + b2f

    assert logits.shape == (B, NUM_CLASSES)
    assert jnp.allclose(logits, ref, atol=2e-2, rtol=2e-2)

    print("KERNEL_OK")
</pallas_src>

<mosaic_0001>
module attributes {stable_mosaic.version = 11 : i64} {
  func.func @_mlp_kernel(%arg0: i32, %arg1: memref<16x768xbf16, #tpu.memory_space<vmem>>, %arg2: memref<768x256xbf16, #tpu.memory_space<vmem>>, %arg3: memref<1x256xf32, #tpu.memory_space<vmem>>, %arg4: memref<256x8xbf16, #tpu.memory_space<vmem>>, %arg5: memref<1x8xf32, #tpu.memory_space<vmem>>, %arg6: memref<16x8xf32, #tpu.memory_space<vmem>>) attributes {dimension_semantics = [#tpu.dimension_semantics<parallel>], iteration_bounds = array<i64: 1>, scalar_prefetch = 0 : i64, scratch_operands = 0 : i64, tpu.core_type = #tpu.core_type<tc>, window_params = [{transform_indices = @transform_0, window_bounds = array<i64: 16, 768>}, {pipeline_mode = #tpu.pipeline_mode<synchronous>, transform_indices = @transform_1, window_bounds = array<i64: 768, 256>}, {pipeline_mode = #tpu.pipeline_mode<synchronous>, transform_indices = @transform_2, window_bounds = array<i64: 1, 256>}, {pipeline_mode = #tpu.pipeline_mode<synchronous>, transform_indices = @transform_3, window_bounds = array<i64: 256, 8>}, {pipeline_mode = #tpu.pipeline_mode<synchronous>, transform_indices = @transform_4, window_bounds = array<i64: 1, 8>}, {transform_indices = @transform_5, window_bounds = array<i64: 16, 8>}]} {
    %c0 = arith.constant 0 : index
    %c0_0 = arith.constant 0 : index
    %0 = vector.load %arg1[%c0, %c0_0] : memref<16x768xbf16, #tpu.memory_space<vmem>>, vector<16x768xbf16>
    %c0_1 = arith.constant 0 : index
    %c0_2 = arith.constant 0 : index
    %1 = vector.load %arg2[%c0_1, %c0_2] : memref<768x256xbf16, #tpu.memory_space<vmem>>, vector<768x256xbf16>
    %cst = arith.constant dense<0.000000e+00> : vector<16x256xf32>
    %2 = tpu.matmul %0, %1, %cst {dimension_numbers = #tpu.dot_dimension_numbers<[1], [0], [0], [1], [0, 0, 1, 1], [], []>} : vector<16x768xbf16>, vector<768x256xbf16>, vector<16x256xf32> -> vector<16x256xf32>
    %c0_3 = arith.constant 0 : index
    %c0_4 = arith.constant 0 : index
    %3 = vector.load %arg3[%c0_3, %c0_4] : memref<1x256xf32, #tpu.memory_space<vmem>>, vector<1x256xf32>
    %4 = vector.broadcast %3 : vector<1x256xf32> to vector<16x256xf32>
    %5 = arith.addf %2, %4 : vector<16x256xf32>
    %cst_5 = arith.constant 0.000000e+00 : f32
    %6 = vector.broadcast %cst_5 : f32 to vector<16x256xf32>
    %7 = arith.maximumf %5, %6 : vector<16x256xf32>
    %8 = arith.truncf %7 : vector<16x256xf32> to vector<16x256xbf16>
    %c0_6 = arith.constant 0 : index
    %c0_7 = arith.constant 0 : index
    %9 = vector.load %arg4[%c0_6, %c0_7] : memref<256x8xbf16, #tpu.memory_space<vmem>>, vector<256x8xbf16>
    %cst_8 = arith.constant dense<0.000000e+00> : vector<16x8xf32>
    %10 = tpu.matmul %8, %9, %cst_8 {dimension_numbers = #tpu.dot_dimension_numbers<[1], [0], [0], [1], [0, 0, 1, 1], [], []>} : vector<16x256xbf16>, vector<256x8xbf16>, vector<16x8xf32> -> vector<16x8xf32>
    %c0_9 = arith.constant 0 : index
    %c0_10 = arith.constant 0 : index
    %11 = vector.load %arg5[%c0_9, %c0_10] : memref<1x8xf32, #tpu.memory_space<vmem>>, vector<1x8xf32>
    %12 = vector.broadcast %11 : vector<1x8xf32> to vector<16x8xf32>
    %13 = arith.addf %10, %12 : vector<16x8xf32>
    %c0_11 = arith.constant 0 : index
    %c0_12 = arith.constant 0 : index
    %14 = vector.load %arg6[%c0_11, %c0_12] : memref<16x8xf32, #tpu.memory_space<vmem>>, vector<16x8xf32>
    tpu.vector_store %arg6[%c0_11, %c0_12], %13 {strides = array<i32>} : memref<16x8xf32, #tpu.memory_space<vmem>>, vector<16x8xf32>,
    return
  }
  func.func @transform_0(%arg0: i32) -> (i32, i32) {
    %c0_i32 = arith.constant 0 : i32
    %c0_i32_0 = arith.constant 0 : i32
    return %arg0, %c0_i32 : i32, i32
  }
  func.func @transform_1(%arg0: i32) -> (i32, i32) {
    %c0_i32 = arith.constant 0 : i32
    %c0_i32_0 = arith.constant 0 : i32
    %c0_i32_1 = arith.constant 0 : i32
    return %c0_i32, %c0_i32_0 : i32, i32
  }
  func.func @transform_2(%arg0: i32) -> (i32, i32) {
    %c0_i32 = arith.constant 0 : i32
    %c0_i32_0 = arith.constant 0 : i32
    %c0_i32_1 = arith.constant 0 : i32
    return %c0_i32, %c0_i32_0 : i32, i32
  }
  func.func @transform_3(%arg0: i32) -> (i32, i32) {
    %c0_i32 = arith.constant 0 : i32
    %c0_i32_0 = arith.constant 0 : i32
    %c0_i32_1 = arith.constant 0 : i32
    return %c0_i32, %c0_i32_0 : i32, i32
  }
  func.func @transform_4(%arg0: i32) -> (i32, i32) {
    %c0_i32 = arith.constant 0 : i32
    %c0_i32_0 = arith.constant 0 : i32
    %c0_i32_1 = arith.constant 0 : i32
    return %c0_i32, %c0_i32_0 : i32, i32
  }
  func.func @transform_5(%arg0: i32) -> (i32, i32) {
    %c0_i32 = arith.constant 0 : i32
    %c0_i32_0 = arith.constant 0 : i32
    return %arg0, %c0_i32 : i32, i32
  }
}

</mosaic_0001>

<bundles_post_ra>
// kernel: audio_classifier_forward.1
= control target key start
LH: loop header
LB: loop body
LE: loop exit
PB: predicated region body
PF: predicated region fallthrough
CT: control target
= control target key end

     0   :  { %10 = vsyncpa [#allocation3], 0  ;;  %s1396_s18 = smov [#allocation2]   ;;  %s1546_s0 = inlined_call_operand.vmem [shape: bf16[4,768], index: 0, kind: input, shape index: {}]   ;;  %s1547_s1 = inlined_call_operand.hbm [shape: bf16[768,256], index: 1, kind: input, shape index: {}]   ;;  %s1548_s2 = inlined_call_operand.vmem [shape: f32[1,256], index: 2, kind: input, shape index: {}]   ;;  %s1549_s3 = inlined_call_operand.vmem [shape: bf16[256,8], index: 3, kind: input, shape index: {}]   ;;  %s1550_s4 = inlined_call_operand.vmem [shape: f32[1,8], index: 4, kind: input, shape index: {}]   ;;  %s1551_s5 = inlined_call_operand.vmem [shape: f32[4,8], index: 5, kind: output, shape index: {}]  }
   0x1   :  { %s18_s19 = sshll.u32 %s1396_s18, 4  ;;  %s1372_s22 = scalar_lea.hbm %s1547_s1, 12288  ;;  %s19_s19 = int_to_ptr.vmem [resolvable:$true] %s18_s19 }
   0x2   :  { %p1373_p0 = scmp.ne.s32.totalorder %s1547_s1, %s1372_s22  ;;  %p1376_p1 = scmp.lt.u32.totalorder %s1372_s22, %s1547_s1 }
   0x4   :  { %p1378_p2 = pnand %p1376_p1, %p1373_p0 }
   0x6   :  { %1381 = shalt.err (!%p1378_p2)
}
   0x7   :  { %s1382_s27 = scalar_lea.vmem %s19_s19, 12288  ;;  %p1387_p4 = scmp.lt.s32.totalorder %s19_s19, %s19_s19 }
   0x8   :  { %p1383_p3 = scmp.ne.s32.totalorder %s19_s19, %s1382_s27  ;;  %p1388_p5 = scmp.lt.s32.totalorder %s1382_s27, %s1382_s27 }
   0xa   :  { %p1389_p6 = por %p1388_p5, %p1387_p4 }
   0xc   :  { %p1390_p7 = pnand %p1389_p6, %p1383_p3 }
   0xe   :  { %1393 = shalt.err (!%p1390_p7)
}
   0xf   :  { %s1397_s28 = smov 128   ;;  %s1398_s29 = smov 8  }
  0x10   :  { %24 = dma.hbm_to_vmem [thread:$0]  %s1547_s1, 12288, %s19_s19, [#allocation3], %s1397_s28, %s1397_s28, %s1398_s29  }
  0x11   :  { %1394 = dma.done.wait [#allocation3], 12288  }
  0x12   :  { %1395 = vsyncadd [#allocation3], 4294955008  ;;  %v1204_v0 = vld [vmem:[#allocation2 + $0x104] ss:$8 sps:$4 sm:$0xff]   ;;  %v1206_v1 = vld [vmem:[#allocation2 + $0x100] ss:$8 sps:$4 sm:$0xff]   ;;  %v141_v10 = vlaneseq }
  0x13   :  { %742 = vmatprep.subr.bf16.mxu0 %v1204_v0  ;;  %v1207_v2 = vld [vmem:[#allocation2 + $0x114] ss:$8 sps:$4 sm:$0xff]   ;;  %v1209_v3 = vld [vmem:[#allocation2 + $0x110] ss:$8 sps:$4 sm:$0xff]   ;;  %v1210_v4 = vld [vmem:[#allocation2 + $0x124] ss:$8 sps:$4 sm:$0xff]  }
  0x14   :  { %743 = vmatpush1.bf16.msra.mxu0 %v1206_v1  ;;  %v1212_v5 = vld [vmem:[#allocation2 + $0x120] ss:$8 sps:$4 sm:$0xff]   ;;  %v1213_v6 = vld [vmem:[#allocation2 + $0x134] ss:$8 sps:$4 sm:$0xff]   ;;  %v1215_v7 = vld [vmem:[#allocation2 + $0x130] ss:$8 sps:$4 sm:$0xff]  }
  0x15   :  { %744 = vmatprep.subr.bf16.mxu0 %v1207_v2  ;;  %v1216_v8 = vld [vmem:[#allocation2 + $0x144] ss:$8 sps:$4 sm:$0xff]   ;;  %v1218_v9 = vld [vmem:[#allocation2 + $0x140] ss:$8 sps:$4 sm:$0xff]   ;;  %v1399_v11 = vmov 1983009808  }
  0x16   :  { %v164_v12 = vunpack.c.l.s4 %v1399_v11  ;;  %v1219_v13 = vld [vmem:[#allocation2 + $0x154] ss:$8 sps:$4 sm:$0xff]   ;;  %v1221_v14 = vld [vmem:[#allocation2 + $0x150] ss:$8 sps:$4 sm:$0xff]   ;;  %v1222_v15 = vld [vmem:[#allocation2 + $0x164] ss:$8 sps:$4 sm:$0xff]  }
  0x17   :  { %v1442_v16 = vshrl.u32 %v141_v10, 7  ;;  %v1249_v18 = vld [vmem:[#allocation2 + $0x4] ss:$8 sps:$4 sm:$0xff]   ;;  %v1251_v19 = vld [vmem:[#allocation2] ss:$8 sps:$4 sm:$0xff]   ;;  %vm1010_vm0 = vcmask 64512  }
  0x18   :  { %745 = vmatpush1.bf16.msra.mxu0 %v1209_v3  ;;  %v165_v17 = vunpack.c.0.s8 %v164_v12  ;;  %v1224_v20 = vld [vmem:[#allocation2 + $0x160] ss:$8 sps:$4 sm:$0xff]   ;;  %v1225_v21 = vld [vmem:[#allocation2 + $0x174] ss:$8 sps:$4 sm:$0xff]   ;;  %699 = vmatprep.subr.bf16.mxu1 %v1249_v18  ;;  %v1257_v23 = vld [vmem:[#allocation2 + $0x10] ss:$8 sps:$4 sm:$0xff]  }
  0x19   :  { %746 = vmatprep.subr.bf16.mxu0 %v1210_v4  ;;  %700 = vmatpush1.bf16.msra.mxu1 %v1251_v19  ;;  %v1255_v22 = vld [vmem:[#allocation2 + $0x14] ss:$8 sps:$4 sm:$0xff]   ;;  %v1258_v25 = vld [vmem:[%s1546_s0 + $0x4] ss:$12 sps:$4 sm:$0xff]   ;;  %v1267_v32 = vld [vmem:[#allocation2 + $0x20] ss:$8 sps:$4 sm:$0xff]  }
  0x1a   :  { %v1445_v24 = vsub.s32 %v165_v17, %v1442_v16  ;;  %701 = vmatprep.subr.bf16.mxu1 %v1255_v22  ;;  %v1260_v26 = vld [vmem:[%s1546_s0 + $0x1c] ss:$12 sps:$4 sm:$0xff]   ;;  %v1227_v27 = vld [vmem:[#allocation2 + $0x170] ss:$8 sps:$4 sm:$0xff]   ;;  %v1228_v28 = vld [vmem:[#allocation2 + $0x184] ss:$8 sps:$4 sm:$0xff]  }
  0x1b   :  { %v1265_v31 = vld [vmem:[#allocation2 + $0x24] ss:$8 sps:$4 sm:$0xff]   ;;  %v1271_v34 = vld [vmem:[#allocation2 + $0x34] ss:$8 sps:$4 sm:$0xff]   ;;  %v1230_v35 = vld [vmem:[#allocation2 + $0x180] ss:$8 sps:$4 sm:$0xff]  }
  0x1c   :  { %747 = vmatpush1.bf16.msra.mxu0 %v1212_v5  ;;  %v1454_v29 = vrot.slane %v1258_v25, %v1445_v24  ;;  %v1457_v30 = vrot.slane %v1260_v26, %v1445_v24  ;;  %v1231_v36 = vld [vmem:[#allocation2 + $0x194] ss:$8 sps:$4 sm:$0xff]   ;;  %v1273_v37 = vld [vmem:[#allocation2 + $0x30] ss:$8 sps:$4 sm:$0xff]   ;;  %v1277_v38 = vld [vmem:[#allocation2 + $0x44] ss:$8 sps:$4 sm:$0xff]  }
  0x1d   :  { %748 = vmatprep.subr.bf16.mxu0 %v1213_v6  ;;  %702 = vmatpush1.bf16.msra.mxu1 %v1257_v23  ;;  %v1233_v39 = vld [vmem:[#allocation2 + $0x190] ss:$8 sps:$4 sm:$0xff]   ;;  %v1234_v40 = vld [vmem:[#allocation2 + $0x1a4] ss:$8 sps:$4 sm:$0xff]   ;;  %v1279_v41 = vld [vmem:[#allocation2 + $0x40] ss:$8 sps:$4 sm:$0xff]  }
  0x1e   :  { %v194_v33 = vcombine.high %v1454_v29, %v1457_v30  ;;  %703 = vmatprep.subr.bf16.mxu1 %v1265_v31  ;;  %v1283_v42 = vld [vmem:[#allocation2 + $0x54] ss:$8 sps:$4 sm:$0xff]   ;;  %v1236_v43 = vld [vmem:[#allocation2 + $0x1a0] ss:$8 sps:$4 sm:$0xff]   ;;  %v1285_v45 = vld [vmem:[#allocation2 + $0x50] ss:$8 sps:$4 sm:$0xff]   ;;  %v193_v4 = vcombine.low %v1454_v29, %v1457_v30 }
  0x1f   :  { %v1237_v44 = vld [vmem:[#allocation2 + $0x1b4] ss:$8 sps:$4 sm:$0xff]   ;;  %v1289_v46 = vld [vmem:[#allocation2 + $0x64] ss:$8 sps:$4 sm:$0xff]   ;;  %v1239_v47 = vld [vmem:[#allocation2 + $0x1b0] ss:$8 sps:$4 sm:$0xff]  }
  0x20   :  { %749 = vmatpush1.bf16.msra.mxu0 %v1215_v7  ;;  %774 = vmatprep.mubr.bf16.mxu0 %v194_v33  ;;  %v1240_v48 = vld [vmem:[#allocation2 + $0x1c4] ss:$8 sps:$4 sm:$0xff]   ;;  %v1291_v49 = vld [vmem:[#allocation2 + $0x60] ss:$8 sps:$4 sm:$0xff]   ;;  %v1295_v50 = vld [vmem:[#allocation2 + $0x74] ss:$8 sps:$4 sm:$0xff]  }
  0x21   :  { %750 = vmatprep.subr.bf16.mxu0 %v1216_v8  ;;  %704 = vmatpush1.bf16.msra.mxu1 %v1267_v32  ;;  %v1242_v51 = vld [vmem:[#allocation2 + $0x1c0] ss:$8 sps:$4 sm:$0xff]   ;;  %v1243_v52 = vld [vmem:[#allocation2 + $0x1d4] ss:$8 sps:$4 sm:$0xff]   ;;  %v1297_v53 = vld [vmem:[#allocation2 + $0x70] ss:$8 sps:$4 sm:$0xff]  }
  0x22   :  { %705 = vmatprep.subr.bf16.mxu1 %v1271_v34  ;;  %v1301_v54 = vld [vmem:[#allocation2 + $0x84] ss:$8 sps:$4 sm:$0xff]   ;;  %v1245_v55 = vld [vmem:[#allocation2 + $0x1d0] ss:$8 sps:$4 sm:$0xff]   ;;  %v1303_v57 = vld [vmem:[#allocation2 + $0x80] ss:$8 sps:$4 sm:$0xff]  }
  0x23   :  { %v1246_v56 = vld [vmem:[#allocation2 + $0x1e4] ss:$8 sps:$4 sm:$0xff]   ;;  %v1307_v58 = vld [vmem:[#allocation2 + $0x94] ss:$8 sps:$4 sm:$0xff]   ;;  %v1248_v59 = vld [vmem:[#allocation2 + $0x1e0] ss:$8 sps:$4 sm:$0xff]  }
  0x24   :  { %751 = vmatpush1.bf16.msra.mxu0 %v1218_v9  ;;  %v1252_v60 = vld [vmem:[#allocation2 + $0x1f4] ss:$8 sps:$4 sm:$0xff]   ;;  %v1309_v61 = vld [vmem:[#allocation2 + $0x90] ss:$8 sps:$4 sm:$0xff]   ;;  %v1313_v62 = vld [vmem:[#allocation2 + $0xa4] ss:$8 sps:$4 sm:$0xff]  }
  0x25   :  { %752 = vmatprep.subr.bf16.mxu0 %v1219_v13  ;;  %706 = vmatpush1.bf16.msra.mxu1 %v1273_v37  ;;  %v1254_v63 = vld [vmem:[#allocation2 + $0x1f0] ss:$8 sps:$4 sm:$0xff]   ;;  %v1264_v0 = vld [vmem:[#allocation2 + $0x204] ss:$8 sps:$4 sm:$0xff]   ;;  %v1315_v1 = vld [vmem:[#allocation2 + $0xa0] ss:$8 sps:$4 sm:$0xff]  }
  0x26   :  { %707 = vmatprep.subr.bf16.mxu1 %v1277_v38  ;;  %v1319_v2 = vld [vmem:[#allocation2 + $0xb4] ss:$8 sps:$4 sm:$0xff]   ;;  %v1262_v3 = vld [vmem:[#allocation2 + $0x200] ss:$8 sps:$4 sm:$0xff]   ;;  %v1321_v6 = vld [vmem:[#allocation2 + $0xb0] ss:$8 sps:$4 sm:$0xff]  }
  0x27   :  { %v1270_v5 = vld [vmem:[#allocation2 + $0x214] ss:$8 sps:$4 sm:$0xff]   ;;  %v1325_v7 = vld [vmem:[#allocation2 + $0xc4] ss:$8 sps:$4 sm:$0xff]   ;;  %v1268_v9 = vld [vmem:[#allocation2 + $0x210] ss:$8 sps:$4 sm:$0xff]  }
  0x28   :  { %753 = vmatpush1.bf16.msra.mxu0 %v1221_v14  ;;  %v1349_v8 = vld [vmem:[%s1546_s0] ss:$12 sps:$4 sm:$0xff]   ;;  %v1350_v10 = vld [vmem:[%s1546_s0 + $0x18] ss:$12 sps:$4 sm:$0xff]   ;;  %v1331_v18 = vld [vmem:[#allocation2 + $0xd4] ss:$8 sps:$4 sm:$0xff]  }
  0x29   :  { %754 = vmatprep.subr.bf16.mxu0 %v1222_v15  ;;  %708 = vmatpush1.bf16.msra.mxu1 %v1279_v41  ;;  %v1276_v11 = vld [vmem:[#allocation2 + $0x224] ss:$8 sps:$4 sm:$0xff]   ;;  %v1327_v12 = vld [vmem:[#allocation2 + $0xc0] ss:$8 sps:$4 sm:$0xff]   ;;  %v169_v13 = vrot.slane %v1349_v8, %v1445_v24  ;;  %v183_v14 = vrot.slane %v1350_v10, %v1445_v24  ;;  %v1282_v23 = vld [vmem:[#allocation2 + $0x234] ss:$8 sps:$4 sm:$0xff]  }
  0x2a   :  { %709 = vmatprep.subr.bf16.mxu1 %v1283_v42  ;;  %v1354_v15 = vld [vmem:[%s1546_s0 + $0x8] ss:$12 sps:$4 sm:$0xff]   ;;  %v1355_v17 = vld [vmem:[%s1546_s0 + $0x20] ss:$12 sps:$4 sm:$0xff]   ;;  %v1333_v25 = vld [vmem:[#allocation2 + $0xd0] ss:$8 sps:$4 sm:$0xff]  }
  0x2b   :  { %v192_v19 = vcombine.high %v169_v13, %v183_v14  ;;  %v1481_v22 = vrot.slane %v1355_v17, %v1445_v24  ;;  %v1288_v29 = vld [vmem:[#allocation2 + $0x244] ss:$8 sps:$4 sm:$0xff]   ;;  %v1339_v30 = vld [vmem:[#allocation2 + $0xe0] ss:$8 sps:$4 sm:$0xff]   ;;  %v1294_v32 = vld [vmem:[#allocation2 + $0x254] ss:$8 sps:$4 sm:$0xff]  }
  0x2c   :  { %755 = vmatpush1.bf16.msra.mxu0 %v1224_v20  ;;  %v1274_v20 = vld [vmem:[#allocation2 + $0x220] ss:$8 sps:$4 sm:$0xff]   ;;  %v1345_v33 = vld [vmem:[#allocation2 + $0xf0] ss:$8 sps:$4 sm:$0xff]   ;;  %v1300_v37 = vld [vmem:[#allocation2 + $0x264] ss:$8 sps:$4 sm:$0xff]  }
  0x2d   :  { %756 = vmatprep.subr.bf16.mxu0 %v1225_v21  ;;  %710 = vmatpush1.bf16.msra.mxu1 %v1285_v45  ;;  %v1478_v21 = vrot.slane %v1354_v15, %v1445_v24  ;;  %v1343_v24 = vld [vmem:[#allocation2 + $0xf4] ss:$8 sps:$4 sm:$0xff]   ;;  %v1286_v31 = vld [vmem:[#allocation2 + $0x240] ss:$8 sps:$4 sm:$0xff]   ;;  %v1312_v45 = vld [vmem:[#allocation2 + $0x284] ss:$8 sps:$4 sm:$0xff]  }
  0x2e   :  { %711 = vmatprep.subr.bf16.mxu1 %v1289_v46  ;;  %731 = vmatprep.mubr.bf16.mxu1 %v192_v19  ;;  %v1356_v34 = vld [vmem:[%s1549_s3 + $0x40] sm:$0xff]   ;;  %v1306_v41 = vld [vmem:[#allocation2 + $0x274] ss:$8 sps:$4 sm:$0xff]   ;;  %v1359_v42 = vld [vmem:[%s1549_s3 + $0x8] sm:$0xff]   ;;  %v147_v15 = vsub.s32 1, %v1442_v16 }
  0x2f   :  { %v212_v26 = vcombine.high %v1478_v21, %v1481_v22  ;;  %v1357_v38 = vld [vmem:[%s1549_s3] sm:$0xff]   ;;  %v1361_v46 = vld [vmem:[%s1549_s3 + $0x10] sm:$0xff]   ;;  %v1371_v8 = vld [vmem:[%s1549_s3 + $0x38] sm:$0xff]  }
  0x30   :  { %757 = vmatpush1.bf16.msra.mxu0 %v1227_v27  ;;  %v1337_v27 = vld [vmem:[#allocation2 + $0xe4] ss:$8 sps:$4 sm:$0xff]  }
  0x31   :  { %758 = vmatprep.subr.bf16.mxu0 %v1228_v28  ;;  %712 = vmatpush1.bf16.msra.mxu1 %v1291_v49  ;;  %v1280_v28 = vld [vmem:[#allocation2 + $0x230] ss:$8 sps:$4 sm:$0xff]   ;;  %v1318_v49 = vld [vmem:[#allocation2 + $0x294] ss:$8 sps:$4 sm:$0xff]  }
  0x32   :  { %713 = vmatprep.subr.bf16.mxu1 %v1295_v50  ;;  %v1363_v50 = vld [vmem:[%s1549_s3 + $0x18] sm:$0xff]  }
  0x34   :  { %759 = vmatpush1.bf16.msra.mxu0 %v1230_v35  ;;  %v1292_v35 = vld [vmem:[#allocation2 + $0x250] ss:$8 sps:$4 sm:$0xff]  }
  0x35   :  { %760 = vmatprep.subr.bf16.mxu0 %v1231_v36  ;;  %714 = vmatpush1.bf16.msra.mxu1 %v1297_v53  ;;  %v191_v36 = vcombine.low %v169_v13, %v183_v14  ;;  %v1322_v53 = vld [vmem:[#allocation2 + $0x2a0] ss:$8 sps:$4 sm:$0xff]   ;;  %v143_v13 = vsub.s32 0, %v1442_v16 }
  0x36   :  { %715 = vmatprep.subr.bf16.mxu1 %v1301_v54  ;;  %v1330_v54 = vld [vmem:[#allocation2 + $0x2b4] ss:$8 sps:$4 sm:$0xff]   ;;  %v139_v14 = vld [vmem:[%s1548_s2] sm:$0x3] }
  0x37   :  { %v144_v17 = vrot.slane %v139_v14, %v143_v13 }
  0x38   :  { %761 = vmatpush1.bf16.msra.mxu0 %v1233_v39  ;;  %v1358_v39 = vld [vmem:[%s1549_s3 + $0x48] sm:$0xff]  }
  0x39   :  { %762 = vmatprep.subr.bf16.mxu0 %v1234_v40  ;;  %716 = vmatpush1.bf16.msra.mxu1 %v1303_v57  ;;  %v1298_v40 = vld [vmem:[#allocation2 + $0x260] ss:$8 sps:$4 sm:$0xff]  }
  0x3a   :  { %717 = vmatprep.subr.bf16.mxu1 %v1307_v58  ;;  %v1334_v57 = vld [vmem:[#allocation2 + $0x2c0] ss:$8 sps:$4 sm:$0xff]   ;;  %v1342_v58 = vld [vmem:[#allocation2 + $0x2d4] ss:$8 sps:$4 sm:$0xff]  }
  0x3c   :  { %763 = vmatpush1.bf16.msra.mxu0 %v1236_v43  ;;  %v1360_v43 = vld [vmem:[%s1549_s3 + $0x50] sm:$0xff]  }
  0x3d   :  { %764 = vmatprep.subr.bf16.mxu0 %v1237_v44  ;;  %718 = vmatpush1.bf16.msra.mxu1 %v1309_v61  ;;  %v1304_v44 = vld [vmem:[#allocation2 + $0x270] ss:$8 sps:$4 sm:$0xff]   ;;  %v1346_v61 = vld [vmem:[#allocation2 + $0x2e0] ss:$8 sps:$4 sm:$0xff]  }
  0x3e   :  { %719 = vmatprep.subr.bf16.mxu1 %v1313_v62  ;;  %v1353_v62 = vld [vmem:[#allocation2 + $0x2f4] ss:$8 sps:$4 sm:$0xff]  }
  0x40   :  { %765 = vmatpush1.bf16.msra.mxu0 %v1239_v47  ;;  %v1362_v47 = vld [vmem:[%s1549_s3 + $0x58] sm:$0xff]  }
  0x41   :  { %766 = vmatprep.subr.bf16.mxu0 %v1240_v48  ;;  %720 = vmatpush1.bf16.msra.mxu1 %v1315_v1  ;;  %v1310_v48 = vld [vmem:[#allocation2 + $0x280] ss:$8 sps:$4 sm:$0xff]  }
  0x42   :  { %721 = vmatprep.subr.bf16.mxu1 %v1319_v2  ;;  %v1364_v1 = vld [vmem:[%s1549_s3 + $0x60] sm:$0xff]  }
  0x43   :  { %v1365_v2 = vld [vmem:[%s1549_s3 + $0x20] sm:$0xff]  }
  0x44   :  { %767 = vmatpush1.bf16.msra.mxu0 %v1242_v51  ;;  %v1316_v51 = vld [vmem:[#allocation2 + $0x290] ss:$8 sps:$4 sm:$0xff]  }
  0x45   :  { %768 = vmatprep.subr.bf16.mxu0 %v1243_v52  ;;  %722 = vmatpush1.bf16.msra.mxu1 %v1321_v6  ;;  %v1324_v52 = vld [vmem:[#allocation2 + $0x2a4] ss:$8 sps:$4 sm:$0xff]   ;;  %v1369_v6 = vld [vmem:[%s1549_s3 + $0x30] sm:$0xff]  }
  0x46   :  { %723 = vmatprep.subr.bf16.mxu1 %v1325_v7  ;;  %v1370_v7 = vld [vmem:[%s1549_s3 + $0x78] sm:$0xff]  }
  0x48   :  { %769 = vmatpush1.bf16.msra.mxu0 %v1245_v55  ;;  %v1328_v55 = vld [vmem:[#allocation2 + $0x2b0] ss:$8 sps:$4 sm:$0xff]  }
  0x49   :  { %770 = vmatprep.subr.bf16.mxu0 %v1246_v56  ;;  %724 = vmatpush1.bf16.msra.mxu1 %v1327_v12  ;;  %v1336_v56 = vld [vmem:[#allocation2 + $0x2c4] ss:$8 sps:$4 sm:$0xff]  }
  0x4a   :  { %725 = vmatprep.subr.bf16.mxu1 %v1331_v18  ;;  %v148_v18 = vrot.slane %v139_v14, %v147_v15 }
  0x4c   :  { %771 = vmatpush1.bf16.msra.mxu0 %v1248_v59  ;;  %v1340_v59 = vld [vmem:[#allocation2 + $0x2d0] ss:$8 sps:$4 sm:$0xff]  }
  0x4d   :  { %772 = vmatprep.subr.bf16.mxu0 %v1252_v60  ;;  %726 = vmatpush1.bf16.msra.mxu1 %v1333_v25  ;;  %v1348_v60 = vld [vmem:[#allocation2 + $0x2e4] ss:$8 sps:$4 sm:$0xff]  }
  0x4e   :  { %727 = vmatprep.subr.bf16.mxu1 %v1337_v27 }
  0x50   :  { %773 = vmatpush1.bf16.msra.mxu0 %v1254_v63  ;;  %v1351_v63 = vld [vmem:[#allocation2 + $0x2f0] ss:$8 sps:$4 sm:$0xff]  }
  0x51   :  { %785 = vmatprep.subr.bf16.mxu0 %v1264_v0  ;;  %728 = vmatpush1.bf16.msra.mxu1 %v1339_v30  ;;  %v211_v0 = vcombine.low %v1478_v21, %v1481_v22 }
  0x52   :  { %729 = vmatprep.subr.bf16.mxu1 %v1343_v24 }
  0x53   :  { %775 = vmatmul.mubr.bf16.vlgmr.msra.gmra.mrb[0].mxu0 %v193_v4  ;;  %v1367_v4 = vld [vmem:[%s1549_s3 + $0x28] sm:$0xff]  }
  0x54   :  { %786 = vmatpush1.bf16.msra.mxu0 %v1262_v3  ;;  %817 = vmatprep.mubr.bf16.mxu0 %v212_v26  ;;  %v1366_v3 = vld [vmem:[%s1549_s3 + $0x68] sm:$0xff]  }
  0x55   :  { %787 = vmatprep.subr.bf16.mxu0 %v1270_v5  ;;  %730 = vmatpush1.bf16.msra.mxu1 %v1345_v33  ;;  %v1368_v5 = vld [vmem:[%s1549_s3 + $0x70] sm:$0xff]  }
  0x56   :  { %1166 = vmatprep.subr.bf16.mxu1 %v1356_v34 }
  0x58   :  { %788 = vmatpush1.bf16.msra.mxu0 %v1268_v9  ;;  %732 = vmatmul.mubr.bf16.vlgmr.msra.gmra.mrb[0].mxu1 %v191_v36 }
  0x59   :  { %789 = vmatprep.subr.bf16.mxu0 %v1276_v11  ;;  %1167 = vmatpush3.bf16.msra.mxu1 %v1357_v38 }
  0x5a   :  { %1168 = vmatprep.subr.bf16.mxu1 %v1358_v39 }
  0x5c   :  { %790 = vmatpush1.bf16.msra.mxu0 %v1274_v20 }
  0x5d   :  { %791 = vmatprep.subr.bf16.mxu0 %v1282_v23  ;;  %1169 = vmatpush3.bf16.msra.mxu1 %v1359_v42 }
  0x5e   :  { %1170 = vmatprep.subr.bf16.mxu1 %v1360_v43 }
  0x60   :  { %792 = vmatpush1.bf16.msra.mxu0 %v1280_v28 }
  0x61   :  { %793 = vmatprep.subr.bf16.mxu0 %v1288_v29  ;;  %1171 = vmatpush3.bf16.msra.mxu1 %v1361_v46 }
  0x62   :  { %1172 = vmatprep.subr.bf16.mxu1 %v1362_v47 }
  0x64   :  { %794 = vmatpush1.bf16.msra.mxu0 %v1286_v31 }
  0x65   :  { %795 = vmatprep.subr.bf16.mxu0 %v1294_v32  ;;  %1173 = vmatpush3.bf16.msra.mxu1 %v1363_v50 }
  0x66   :  { %1174 = vmatprep.subr.bf16.mxu1 %v1364_v1 }
  0x68   :  { %796 = vmatpush1.bf16.msra.mxu0 %v1292_v35 }
  0x69   :  { %797 = vmatprep.subr.bf16.mxu0 %v1300_v37  ;;  %1175 = vmatpush3.bf16.msra.mxu1 %v1365_v2  ;;  %v1149_v37 = vld [vmem:[%s1550_s4] ss:$0 sm:$0xff] }
  0x6a   :  { %1176 = vmatprep.subr.bf16.mxu1 %v1366_v3 }
  0x6c   :  { %798 = vmatpush1.bf16.msra.mxu0 %v1298_v40 }
  0x6d   :  { %799 = vmatprep.subr.bf16.mxu0 %v1306_v41  ;;  %1177 = vmatpush3.bf16.msra.mxu1 %v1367_v4 }
  0x6e   :  { %1178 = vmatprep.subr.bf16.mxu1 %v1368_v5 }
  0x70   :  { %800 = vmatpush1.bf16.msra.mxu0 %v1304_v44 }
  0x71   :  { %801 = vmatprep.subr.bf16.mxu0 %v1312_v45  ;;  %1179 = vmatpush3.bf16.msra.mxu1 %v1369_v6 }
  0x72   :  { %1180 = vmatprep.subr.bf16.mxu1 %v1370_v7 }
  0x74   :  { %802 = vmatpush1.bf16.msra.mxu0 %v1310_v48 }
  0x75   :  { %803 = vmatprep.subr.bf16.mxu0 %v1318_v49  ;;  %1181 = vmatpush3.bf16.msra.mxu1 %v1371_v8 }
  0x78   :  { %804 = vmatpush1.bf16.msra.mxu0 %v1316_v51 }
  0x79   :  { %805 = vmatprep.subr.bf16.mxu0 %v1324_v52 }
  0x7c   :  { %806 = vmatpush1.bf16.msra.mxu0 %v1322_v53 }
  0x7d   :  { %807 = vmatprep.subr.bf16.mxu0 %v1330_v54 }
  0x80   :  { %808 = vmatpush1.bf16.msra.mxu0 %v1328_v55 }
  0x81   :  { %809 = vmatprep.subr.bf16.mxu0 %v1336_v56 }
  0x84   :  { %810 = vmatpush1.bf16.msra.mxu0 %v1334_v57 }
  0x85   :  { %811 = vmatprep.subr.bf16.mxu0 %v1342_v58 }
  0x88   :  { %812 = vmatpush1.bf16.msra.mxu0 %v1340_v59 }
  0x89   :  { %813 = vmatprep.subr.bf16.mxu0 %v1348_v60 }
  0x8c   :  { %814 = vmatpush1.bf16.msra.mxu0 %v1346_v61 }
  0x8d   :  { %815 = vmatprep.subr.bf16.mxu0 %v1353_v62 }
  0x90   :  { %816 = vmatpush1.bf16.msra.mxu0 %v1351_v63 }
  0x93   :  { %818 = vmatmul.mubr.bf16.vlgmr.msra.gmra.mrb[0].mxu0 %v211_v0 }
 0x12b   :  { %v733_v9 = vpop.f32.mrb[0].mxu1 }
 0x12c   :  { %v735_v10 = vpop.f32.mrb[1].mxu1  ;;  %v734_v19 = vadd.f32 %v733_v9, %v144_v17 }
 0x12d   :  { %v737_v11 = vpop.f32.mrb[2].mxu1  ;;  %v736_v20 = vadd.f32 %v735_v10, %v148_v18 }
 0x12e   :  { %v739_v12 = vpop.f32.mrb[3].mxu1  ;;  %v738_v22 = vadd.f32 %v737_v11, %v144_v17 }
 0x12f   :  { %v740_v26 = vadd.f32 %v739_v12, %v148_v18 }
 0x166   :  { %v819_v21 = vpop.f32.mrb[0].mxu0 }
 0x167   :  { %v1189_v23 = vadd.f32 %v819_v21, %v734_v19  ;;  %v821_v25 = vpop.f32.mrb[1].mxu0 }
 0x168   :  { %v1191_v27 = vadd.f32 %v821_v25, %v736_v20  ;;  %v823_v28 = vpop.f32.mrb[2].mxu0 }
 0x169   :  { %v1193_v29 = vadd.f32 %v823_v28, %v738_v22  ;;  %v825_v30 = vpop.f32.mrb[3].mxu0  ;;  %v828_v31 = vmax.f32 %v1189_v23, 0.0 }
 0x16a   :  { %v1195_v24 = vadd.f32 %v825_v30, %v740_v26  ;;  %v829_v33 = vmax.f32 %v1191_v27, 0.0 }
 0x16b   :  { %v830_v32 = vmax.f32 %v1193_v29, 0.0 }
 0x16c   :  { %v831_v34 = vmax.f32 %v1195_v24, 0.0 }
 0x16d   :  { %v832_v35 = vpack.c.bf16 %v830_v32, %v828_v31 }
 0x16e   :  { %v833_v16 = vpack.c.bf16 %v831_v34, %v829_v33 }
 0x170   :  { %1001 = vmatprep.mubr.bf16.mxu1 %v833_v16 }
 0x171   :  { %1002 = vmatmul.mubr.bf16.vlgmr.msra.gmra.mrb[4].mxu1 %v832_v35 }
 0x244   :  { %v1182_v36 = vpop.f32.mrb[4].mxu1 }
 0x245   :  { %v1183_v38 = vpop.f32.mrb[5].mxu1 }
 0x246   :  { %v1184_v39 = vadd.f32 %v1183_v38, %v1182_v36  ;;  %v1185_v40 = vpop.f32.mrb[6].mxu1 }
 0x247   :  { %v1186_v41 = vpop.f32.mrb[7].mxu1 }
 0x248   :  { %v1004_v42 = vadd.f32 %v1184_v39, %v1149_v37 }
 0x24a   :  { %1011 = vst.msk [vmem:[#allocation4] sm:$0xff] %vm1010_vm0, %v1004_v42 }
 0x251   :  { %v1030_v43 = vld [vmem:[#allocation4] sm:$0xf] }
 0x252   :  { %1031 = vst [vmem:[%s1551_s5] sm:$0xf] %v1030_v43 }
 0x253   :  { %1048 = vsyncpa [#allocation3], 1 }

</bundles_post_ra>
